<compile_context>
chip_gen: v5e
topology: v5e:2x2
jax: 0.10.0
libtpu: 0.0.40
codegen_flags: <defaults>
</compile_context>

<pallas_src>
import math
import functools

import jax
import jax.numpy as jnp
from jax.experimental import pallas as pl
from jax.experimental.pallas import tpu as pltpu


def _round_up(x, m):
    return ((x + m - 1) // m) * m


def _vmem_capacity_bytes():
    """Physical VMEM per TensorCore (128 MiB on v5e/v6e, 64 MiB on v7x)."""
    try:
        cap = int(pltpu.get_tpu_info().vmem_capacity_bytes)
        if cap > 0:
            return cap
    except Exception:
        pass
    return 64 << 20  # conservative default (v7x)


# ---------------------------------------------------------------------------
# Kernels
# ---------------------------------------------------------------------------
def _logreg_resident_kernel(x_ref, wt_ref, b_ref, o_ref):
    """y = x @ W^T + b with the whole (K, C_pad) weight resident in VMEM.

    Grid = (num_m_tiles,).  One MXU dot per tile with f32 accumulation via
    preferred_element_type, bias add in f32, single cast, lane-dense store.
    No accumulator scratch, no K round-trips.
    """
    acc = jnp.dot(x_ref[...], wt_ref[...], preferred_element_type=jnp.float32)
    o_ref[...] = (acc + b_ref[...]).astype(o_ref.dtype)


def _logreg_tiled_kernel(x_ref, wt_ref, b_ref, o_ref, acc_ref):
    """Fallback for very large ft_in: grid = (num_m, num_k), f32 accumulator."""
    k = pl.program_id(1)

    @pl.when(k == 0)
    def _():
        acc_ref[...] = jnp.zeros_like(acc_ref)

    acc_ref[...] += jnp.dot(
        x_ref[...], wt_ref[...], preferred_element_type=jnp.float32
    )

    @pl.when(k == pl.num_programs(1) - 1)
    def _():
        o_ref[...] = (acc_ref[...] + b_ref[...]).astype(o_ref.dtype)


# ---------------------------------------------------------------------------
# One-time parameter prep
# ---------------------------------------------------------------------------
def prepare_logreg_params(weight, bias, *, compute_dtype=None):
    """Transpose + lane-pad the nn.Linear parameters ONCE.

    weight: (nb_classes, ft_in)   (PyTorch nn.Linear layout)
    bias:   (nb_classes,)
    compute_dtype: optional (e.g. jnp.bfloat16) for the matmul inputs; bias
    add / epilogue stays f32.
    """
    nb_classes, ft_in = weight.shape
    if compute_dtype is None:
        compute_dtype = weight.dtype
    compute_dtype = jnp.dtype(compute_dtype)

    # Lane-dense output stores: pad classes to 128; use 256 granularity above
    # 128 so the 256x256 MXUs on v6e/v7x are fully fed.
    c_pad = 128 if nb_classes <= 128 else _round_up(nb_classes, 256)

    budget = int(_vmem_capacity_bytes() * 0.70)
    item = compute_dtype.itemsize

    # Keep the whole W^T resident whenever it comfortably fits next to a
    # reasonable x tile (covers essentially all LogReg configurations).
    w_bytes = ft_in * c_pad * item
    resident = (2 * w_bytes + 2 * 256 * ft_in * item + (8 << 20)) <= budget

    if resident:
        k_pad, tk, num_k = ft_in, ft_in, 1
    else:
        tk = 2048  # multiple of 128
        k_pad = _round_up(ft_in, tk)
        num_k = k_pad // tk

    wt = weight.T.astype(compute_dtype)  # (ft_in, nb_classes), done once
    if k_pad == ft_in and c_pad == nb_classes:
        wt_padded = wt
    else:
        wt_padded = jnp.zeros((k_pad, c_pad), dtype=compute_dtype)
        wt_padded = wt_padded.at[:ft_in, :nb_classes].set(wt)

    bias_padded = jnp.zeros((1, c_pad), dtype=jnp.float32)
    bias_padded = bias_padded.at[0, :nb_classes].set(bias.astype(jnp.float32))

    meta = dict(ft_in=ft_in, nb_classes=nb_classes, c_pad=c_pad,
                k_pad=k_pad, tk=tk, num_k=num_k,
                compute_dtype=str(compute_dtype))
    return wt_padded, bias_padded, meta


# ---------------------------------------------------------------------------
# Forward
# ---------------------------------------------------------------------------
@functools.partial(
    jax.jit,
    static_argnames=("ft_in", "nb_classes", "c_pad", "k_pad", "tk", "num_k",
                     "compute_dtype"),
)
def _logreg_forward_impl(seq, wt_padded, bias_padded, *, ft_in, nb_classes,
                         c_pad, k_pad, tk, num_k, compute_dtype):
    n = seq.shape[0]
    out_dtype = seq.dtype
    cdt = jnp.dtype(compute_dtype)

    x = seq if seq.dtype == cdt else seq.astype(cdt)

    x_item = cdt.itemsize
    out_item = jnp.dtype(out_dtype).itemsize
    row_align = 16 if x_item < 4 else 8  # bf16 packs 2 rows / sublane

    budget = int(_vmem_capacity_bytes() * 0.70)

    if num_k == 1:
        # ------------------ resident-weight fast path ----------------------
        fixed = 2 * k_pad * c_pad * x_item + 2 * c_pad * 4 + (2 << 20)
        per_row = 2 * k_pad * x_item + 2 * c_pad * out_item
        tm_cap = max((budget - fixed) // per_row, row_align)
        n_up = _round_up(max(n, row_align), row_align)
        tm = int(min(1024, tm_cap, n_up))
        tm = max((tm // row_align) * row_align, row_align)

        num_m = pl.cdiv(n, tm)
        # v7x megacore: prefer an even M-tile count so both TCs get work.
        if num_m > 1 and num_m % 2 == 1 and tm > 2 * row_align:
            tm_even = _round_up(-(-n // (num_m + 1)), row_align)
            if tm_even >= row_align:
                tm = tm_even
                num_m = pl.cdiv(n, tm)

        vmem_bytes = (2 * tm * k_pad * x_item        # x tile (double-buffered)
                      + 2 * k_pad * c_pad * x_item   # resident W^T
                      + 2 * c_pad * 4                # bias
                      + 2 * tm * c_pad * out_item)   # output tile
        vmem_limit = int(min(max(int(vmem_bytes * 1.5) + (4 << 20),
                                 vmem_bytes + (2 << 20)), budget))

        cost = pl.CostEstimate(
            flops=2 * n * k_pad * c_pad,
            transcendentals=0,
            bytes_accessed=(n * k_pad * x_item + k_pad * c_pad * x_item
                            + c_pad * 4 + n * c_pad * out_item),
        )

        out_padded = pl.pallas_call(
            _logreg_resident_kernel,
            out_shape=jax.ShapeDtypeStruct((n, c_pad), out_dtype),
            grid_spec=pltpu.PrefetchScalarGridSpec(
                num_scalar_prefetch=0,
                grid=(num_m,),
                in_specs=[
                    pl.BlockSpec((tm, k_pad), lambda i: (i, 0)),      # x
                    pl.BlockSpec((k_pad, c_pad), lambda i: (0, 0)),   # W^T
                    pl.BlockSpec((1, c_pad), lambda i: (0, 0)),       # bias
                ],
                out_specs=pl.BlockSpec((tm, c_pad), lambda i: (i, 0)),
            ),
            compiler_params=pltpu.CompilerParams(
                dimension_semantics=("parallel",),
                vmem_limit_bytes=vmem_limit,
            ),
            cost_estimate=cost,
        )(x, wt_padded, bias_padded)
    else:
        # ------------------ huge-K fallback (tiled reduction) --------------
        # Keep K exact inside the kernel: zero-pad x along K once (rare path;
        # padded columns hit zero-padded weight rows -> contribute 0).
        if k_pad != ft_in:
            x_full = jnp.zeros((n, k_pad), dtype=cdt)
            x_full = x_full.at[:, :ft_in].set(x)
        else:
            x_full = x

        fixed = 2 * tk * c_pad * x_item + 2 * c_pad * 4 + (2 << 20)
        per_row = 2 * tk * x_item + 2 * c_pad * out_item + c_pad * 4
        tm_cap = max((budget - fixed) // per_row, row_align)
        n_up = _round_up(max(n, row_align), row_align)
        tm = int(min(512, tm_cap, n_up))
        tm = max((tm // row_align) * row_align, row_align)
        num_m = pl.cdiv(n, tm)

        vmem_bytes = (2 * tm * tk * x_item + 2 * tk * c_pad * x_item
                      + 2 * c_pad * 4 + 2 * tm * c_pad * out_item
                      + tm * c_pad * 4)
        vmem_limit = int(min(max(int(vmem_bytes * 1.5) + (4 << 20),
                                 vmem_bytes + (2 << 20)), budget))

        cost = pl.CostEstimate(
            flops=2 * n * k_pad * c_pad,
            transcendentals=0,
            bytes_accessed=(n * k_pad * x_item
                            + num_m * k_pad * c_pad * x_item  # W refetch / M tile
                            + c_pad * 4 + n * c_pad * out_item),
        )

        out_padded = pl.pallas_call(
            _logreg_tiled_kernel,
            out_shape=jax.ShapeDtypeStruct((n, c_pad), out_dtype),
            grid_spec=pltpu.PrefetchScalarGridSpec(
                num_scalar_prefetch=0,
                grid=(num_m, num_k),
                in_specs=[
                    pl.BlockSpec((tm, tk), lambda i, k: (i, k)),      # x
                    pl.BlockSpec((tk, c_pad), lambda i, k: (k, 0)),   # W^T
                    pl.BlockSpec((1, c_pad), lambda i, k: (0, 0)),    # bias
                ],
                out_specs=pl.BlockSpec((tm, c_pad), lambda i, k: (i, 0)),
                scratch_shapes=[pltpu.VMEM((tm, c_pad), jnp.float32)],
            ),
            compiler_params=pltpu.CompilerParams(
                dimension_semantics=("parallel", "arbitrary"),
                vmem_limit_bytes=vmem_limit,
            ),
            cost_estimate=cost,
        )(x_full, wt_padded, bias_padded)

    return out_padded[:, :nb_classes]


def logreg_forward(seq, wt_padded, bias_padded, meta):
    """seq: (N, ft_in); wt_padded/bias_padded/meta from prepare_logreg_params."""
    return _logreg_forward_impl(seq, wt_padded, bias_padded, **meta)


def init_logreg_params(key, ft_in, nb_classes, dtype=jnp.float32):
    # Matches torch.nn.init.xavier_uniform_ on weight, zeros on bias.
    limit = math.sqrt(6.0 / (ft_in + nb_classes))
    weight = jax.random.uniform(
        key, (nb_classes, ft_in), dtype=dtype, minval=-limit, maxval=limit
    )
    bias = jnp.zeros((nb_classes,), dtype=dtype)
    return weight, bias


if __name__ == "__main__":
    key = jax.random.PRNGKey(0)
    k_w, k_x = jax.random.split(key)

    batch = 8
    ft_in = 32
    nb_classes = 16

    weight, bias = init_logreg_params(k_w, ft_in, nb_classes)
    seq = jax.random.normal(k_x, (batch, ft_in), dtype=jnp.float32)

    # One-time parameter prep (transpose + lane padding).  Pass
    # compute_dtype=jnp.bfloat16 for the halved-HBM-traffic path on large
    # problems; f32 here so the tight reference check below holds.
    wt_padded, bias_padded, meta = prepare_logreg_params(weight, bias)

    out = logreg_forward(seq, wt_padded, bias_padded, meta)
    out = jax.block_until_ready(out)

    # Reference check against plain JAX (same math as nn.Linear forward).
    ref = seq @ weight.T + bias
    assert out.shape == (batch, nb_classes)
    assert jnp.allclose(out, ref, atol=1e-5, rtol=1e-5)

    print("KERNEL_OK")
</pallas_src>

<mosaic_0001>
module attributes {stable_mosaic.version = 11 : i64} {
  func.func @_logreg_resident_kernel(%arg0: i32, %arg1: memref<8x32xf32, #tpu.memory_space<vmem>>, %arg2: memref<32x128xf32, #tpu.memory_space<vmem>>, %arg3: memref<1x128xf32, #tpu.memory_space<vmem>>, %arg4: memref<8x128xf32, #tpu.memory_space<vmem>>) attributes {dimension_semantics = [#tpu.dimension_semantics<parallel>], iteration_bounds = array<i64: 1>, scalar_prefetch = 0 : i64, scratch_operands = 0 : i64, tpu.core_type = #tpu.core_type<tc>, window_params = [{transform_indices = @transform_0, window_bounds = array<i64: 8, 32>}, {pipeline_mode = #tpu.pipeline_mode<synchronous>, transform_indices = @transform_1, window_bounds = array<i64: 32, 128>}, {pipeline_mode = #tpu.pipeline_mode<synchronous>, transform_indices = @transform_2, window_bounds = array<i64: 1, 128>}, {transform_indices = @transform_3, window_bounds = array<i64: 8, 128>}]} {
    %c0 = arith.constant 0 : index
    %c0_0 = arith.constant 0 : index
    %0 = vector.load %arg1[%c0, %c0_0] : memref<8x32xf32, #tpu.memory_space<vmem>>, vector<8x32xf32>
    %c0_1 = arith.constant 0 : index
    %c0_2 = arith.constant 0 : index
    %1 = vector.load %arg2[%c0_1, %c0_2] : memref<32x128xf32, #tpu.memory_space<vmem>>, vector<32x128xf32>
    %cst = arith.constant dense<0.000000e+00> : vector<8x128xf32>
    %2 = tpu.matmul %0, %1, %cst {dimension_numbers = #tpu.dot_dimension_numbers<[1], [0], [0], [1], [0, 0, 1, 1], [], []>} : vector<8x32xf32>, vector<32x128xf32>, vector<8x128xf32> -> vector<8x128xf32>
    %c0_3 = arith.constant 0 : index
    %c0_4 = arith.constant 0 : index
    %3 = vector.load %arg3[%c0_3, %c0_4] : memref<1x128xf32, #tpu.memory_space<vmem>>, vector<1x128xf32>
    %4 = vector.broadcast %3 : vector<1x128xf32> to vector<8x128xf32>
    %5 = arith.addf %2, %4 : vector<8x128xf32>
    %c0_5 = arith.constant 0 : index
    %c0_6 = arith.constant 0 : index
    %6 = vector.load %arg4[%c0_5, %c0_6] : memref<8x128xf32, #tpu.memory_space<vmem>>, vector<8x128xf32>
    tpu.vector_store %arg4[%c0_5, %c0_6], %5 {strides = array<i32>} : memref<8x128xf32, #tpu.memory_space<vmem>>, vector<8x128xf32>,
    return
  }
  func.func @transform_0(%arg0: i32) -> (i32, i32) {
    %c0_i32 = arith.constant 0 : i32
    %c0_i32_0 = arith.constant 0 : i32
    return %arg0, %c0_i32 : i32, i32
  }
  func.func @transform_1(%arg0: i32) -> (i32, i32) {
    %c0_i32 = arith.constant 0 : i32
    %c0_i32_0 = arith.constant 0 : i32
    %c0_i32_1 = arith.constant 0 : i32
    return %c0_i32, %c0_i32_0 : i32, i32
  }
  func.func @transform_2(%arg0: i32) -> (i32, i32) {
    %c0_i32 = arith.constant 0 : i32
    %c0_i32_0 = arith.constant 0 : i32
    %c0_i32_1 = arith.constant 0 : i32
    return %c0_i32, %c0_i32_0 : i32, i32
  }
  func.func @transform_3(%arg0: i32) -> (i32, i32) {
    %c0_i32 = arith.constant 0 : i32
    %c0_i32_0 = arith.constant 0 : i32
    return %arg0, %c0_i32 : i32, i32
  }
}

</mosaic_0001>

<bundles_post_ra>
// kernel: _logreg_forward_impl.1
= control target key start
LH: loop header
LB: loop body
LE: loop exit
PB: predicated region body
PF: predicated region fallthrough
CT: control target
= control target key end

     0   :  { %8 = vsyncpa [#allocation3], 0  ;;  %s219_s0 = inlined_call_operand.hbm [shape: f32[8,32], index: 0, kind: input, shape index: {}]   ;;  %s220_s1 = inlined_call_operand.hbm [shape: f32[32,128], index: 1, kind: input, shape index: {}]   ;;  %s221_s2 = inlined_call_operand.vmem [shape: f32[1,128], index: 2, kind: input, shape index: {}]   ;;  %s222_s3 = inlined_call_operand.hbm [shape: f32[8,128], index: 3, kind: output, shape index: {}]  }
   0x1   :  { %9 = vsyncpa [#allocation6], 0 }
   0x2   :  { %10 = vsyncpa [#allocation4], 0  ;;  %s16_s14 = sshll.u32 %s219_s0, 4  ;;  %s182_s15 = smov [#allocation2]   ;;  %s17_s14 = int_to_ptr.hbm [resolvable:$true] %s16_s14 }
   0x3   :  { %s18_s16 = sshll.u32 %s182_s15, 4  ;;  %s26_s19 = sshll.u32 %s220_s1, 4  ;;  %s19_s16 = int_to_ptr.vmem [resolvable:$true] %s18_s16  ;;  %s27_s19 = int_to_ptr.hbm [resolvable:$true] %s26_s19 }
   0x4   :  { %21 = dma.hbm_to_vmem [thread:$0]  %s17_s14, 128, %s19_s16, [#allocation3]  }
   0x5   :  { %s183_s20 = smov [#allocation5]   ;;  %s184_s22 = smov 128  }
   0x6   :  { %s28_s21 = sshll.u32 %s183_s20, 4  ;;  %s185_s23 = smov 8   ;;  %s29_s21 = int_to_ptr.vmem [resolvable:$true] %s28_s21 }
   0x7   :  { %34 = dma.hbm_to_vmem [thread:$0]  %s27_s19, 512, %s29_s21, [#allocation6], %s184_s22, %s184_s22, %s185_s23  }
   0x8   :  { %176 = dma.done.wait [#allocation3], 128  }
   0x9   :  { %177 = vsyncadd [#allocation3], 4294967168 }
   0xa   :  { %178 = dma.done.wait [#allocation6], 512  }
   0xb   :  { %179 = vsyncadd [#allocation6], 4294966784  ;;  %v49_v0 = vld [vmem:[#allocation5 + $0x18] sm:$0xff]  ;;  %v48_v1 = vld [vmem:[#allocation5 + $0x10] sm:$0xff]  ;;  %vm54_vm0 = vcmask 261120   ;;  %s186_s24 = smov [#allocation7]  }
   0xc   :  { %70 = vmatpush.msra.mxu0 %v49_v0  ;;  %v47_v2 = vld [vmem:[#allocation5 + $0x8] sm:$0xff]  ;;  %v46_v3 = vld [vmem:[#allocation5] sm:$0xff]  ;;  %v45_v4 = vld [vmem:[#allocation2] sm:$0xff]  ;;  %s84_s25 = sshll.u32 %s186_s24, 4  ;;  %s86_s28 = sshll.u32 %s222_s3, 4  ;;  %s85_s25 = int_to_ptr.vmem [resolvable:$true] %s84_s25  ;;  %s87_s28 = int_to_ptr.hbm [resolvable:$true] %s86_s28 }
   0xd   :  { %v103_v5 = vld [vmem:[%s221_s2] ss:$0 sm:$0xff] }
   0xe   :  { %71 = vmatpush.msra.mxu0 %v48_v1 }
  0x10   :  { %72 = vmatpush.msra.mxu0 %v47_v2 }
  0x12   :  { %73 = vmatpush.msra.mxu0 %v46_v3 }
  0x13   :  { %97 = vmatmul.msk.f32.vlgmr.msra.gmra.mxu0 %vm54_vm0, %v45_v4 }
  0x90   :  { %v75_v6 = vpop.f32.mrf.mxu0 }
  0x91   :  { %v76_v7 = vadd.f32 %v103_v5, %v75_v6 }
  0x93   :  { %78 = vst [vmem:[#allocation7] sm:$0xff] %v76_v7 }
  0x94   :  { %89 = dma.vmem_to_hbm [thread:$0]  %s85_s25, 128, %s87_s28, [#allocation4]  }
  0x95   :  { %180 = dma.done.wait [#allocation4], 128  }
  0x96   :  { %181 = vsyncadd [#allocation4], 4294967168 }
  0x97   :  { %94 = vsyncpa [#allocation3], 1 }
  0x98   :  { %95 = vsyncpa [#allocation6], 1 }
  0x99   :  { %96 = vsyncpa [#allocation4], 1 }

</bundles_post_ra>
